<compile_context>
chip_gen: v7x
topology: tpu7x:2x2x1
jax: 0.10.0
libtpu: 0.0.40
codegen_flags: <defaults>
</compile_context>

<pallas_src>
import functools
import math

import jax
import jax.numpy as jnp
from jax.experimental import pallas as pl
from jax.experimental.pallas import tpu as pltpu


def _cdiv(a, b):
    return -(-a // b)


def _matmul_bias_kernel(x_ref, w_ref, b_ref, o_ref, acc_ref, *, group_tiles=None):
    """Accumulate one (tm, tn) output tile over the K grid axis (axis 2).

    group_tiles=(gpk, gpn): when running on a block-diagonal weight whose tile
    boundaries align with group boundaries, skip K steps whose (k, j) tile is
    entirely inside an all-zero off-diagonal block (saves MXU work).
    """
    k = pl.program_id(2)

    @pl.when(k == 0)
    def _():
        acc_ref[...] = jnp.zeros_like(acc_ref)

    def _accumulate():
        acc_ref[...] += jnp.dot(x_ref[...], w_ref[...],
                                preferred_element_type=jnp.float32)

    if group_tiles is None:
        _accumulate()
    else:
        gpk, gpn = group_tiles  # groups spanned by one K tile / one N tile
        j = pl.program_id(1)
        # Group ranges [k*gpk, (k+1)*gpk) and [j*gpn, (j+1)*gpn) intersect?
        nonzero = jnp.logical_and(k * gpk < (j + 1) * gpn,
                                  j * gpn < (k + 1) * gpk)
        pl.when(nonzero)(_accumulate)

    @pl.when(k == pl.num_programs(2) - 1)
    def _():
        o_ref[...] = (acc_ref[...]
                      + b_ref[...].astype(jnp.float32)).astype(o_ref.dtype)


def _tpu_vmem_bytes():
    try:
        info = pltpu.get_tpu_info()
        return int(getattr(info, "vmem_capacity_bytes", 64 * 1024 * 1024))
    except Exception:
        return 64 * 1024 * 1024  # conservative (v7x per-TensorCore)


def _largest_aligned_divisor(dim, cap):
    """Largest t <= cap with t % 128 == 0 and dim % t == 0 (dim % 128 == 0)."""
    best = 128
    t = 128
    cap = min(cap, dim)
    while t <= cap:
        if dim % t == 0:
            best = t
        t += 128
    return best


def grouped_linear(src, weight, bias=None, *, groups, compute_dtype=None,
                   tm_max=None, tk_max=None, tn_max=None):
    """src: (..., in_channels); weight: (groups, Cin_g, Cout_g); bias: (out_channels,)."""
    g, cin_g, cout_g = weight.shape
    if g != groups:
        raise ValueError(f"weight.shape[0]={g} does not match groups={groups}")
    in_channels = groups * cin_g
    out_channels = groups * cout_g
    if src.shape[-1] != in_channels:
        raise ValueError(
            f"src last dim {src.shape[-1]} != groups*Cin_g = {in_channels}")

    # Generation-aware tile caps: 128 MiB VMEM parts (v5e/v6e) take 1024-wide
    # M/N tiles; 64 MiB parts (v7x) stay at 512.  Streaming traffic scales as
    # ~(1/tm + 1/tn), so bigger tiles directly lower HBM cost.
    vmem_cap = _tpu_vmem_bytes()
    big_vmem = vmem_cap >= 96 * 1024 * 1024
    if tm_max is None:
        tm_max = 1024 if big_vmem else 512
    if tn_max is None:
        tn_max = 1024 if big_vmem else 512
    if tk_max is None:
        tk_max = 512

    lead = src.shape[:-1]
    n_rows = 1
    for d in lead:
        n_rows *= int(d)

    out_dtype = src.dtype
    # (..., Cin) -> (N, Cin): leading dims merged, no data movement.  The
    # PyTorch module's group-major transposes are folded into index_maps.
    x2d = src.reshape(n_rows, in_channels)

    # Optional reduced-precision compute (f32 accumulation kept).  Casting in
    # the wrapper (not inside the kernel) halves x/weight DMA traffic.
    if compute_dtype is not None:
        x2d = x2d.astype(compute_dtype)
        weight = weight.astype(compute_dtype)

    if bias is None:
        b2d = jnp.zeros((1, out_channels), dtype=jnp.float32)
    else:
        b2d = bias.reshape(1, out_channels).astype(jnp.float32)

    # True grouped path: weight stays (G, Cin_g, Cout_g); the group is derived
    # from the output-column block index.  Needs 128-aligned per-group dims.
    use_grouped = groups > 1 and cin_g % 128 == 0 and cout_g % 128 == 0

    if use_grouped:
        tk = _largest_aligned_divisor(cin_g, tk_max)
        tn = _largest_aligned_divisor(cout_g, tn_max)
        k_blocks = cin_g // tk
        n_g_blocks = cout_g // tn
        n_blocks_total = groups * n_g_blocks
        group_tiles = None
        w_operand = weight
        w_elem = weight.dtype.itemsize
    else:
        # Dense / block-diagonal fallback (groups == 1, or per-group channels
        # too small for 128-aligned grouped tiles).
        if groups > 1:
            # TODO(synk): the block-diagonal fold should be precomputed once
            # outside the step (weights are static across calls); rebuilt per
            # call here only to keep this example self-contained.
            w2d = jnp.zeros((in_channels, out_channels), dtype=weight.dtype)
            for gi in range(groups):
                w2d = jax.lax.dynamic_update_slice(
                    w2d, weight[gi], (gi * cin_g, gi * cout_g))
        else:
            w2d = weight[0]

        # N (output columns): no padding needed; a partial trailing block is
        # safe (out-of-bounds output writes are dropped).
        if out_channels <= tn_max:
            tn = out_channels
        elif out_channels % 128 == 0:
            tn = _largest_aligned_divisor(out_channels, tn_max)
        else:
            tn = tn_max
        n_blocks_total = _cdiv(out_channels, tn)

        # K (contraction): must be exactly tiled or explicitly zero-padded.
        if in_channels <= tk_max:
            tk, cin_pad = in_channels, in_channels
        elif in_channels % 128 == 0:
            tk, cin_pad = _largest_aligned_divisor(in_channels, tk_max), in_channels
        else:
            tk = tk_max
            cin_pad = _cdiv(in_channels, tk) * tk
        if cin_pad != in_channels:
            # TODO(synk): avoid this activation copy for non-128-aligned Cin
            # (a ragged last K block would need an in-kernel mask instead).
            x2d = jnp.pad(x2d, ((0, 0), (0, cin_pad - in_channels)))
            w2d = jnp.pad(w2d, ((0, cin_pad - in_channels), (0, 0)))
        k_blocks = cin_pad // tk

        # Skip all-zero off-diagonal weight tiles (saves MXU work) whenever
        # the tiling aligns with group boundaries.
        if groups > 1 and tk % cin_g == 0 and tn % cout_g == 0:
            group_tiles = (tk // cin_g, tn // cout_g)
        else:
            group_tiles = None
        w_operand = w2d
        w_elem = w2d.dtype.itemsize

    # M (rows): no padding; a partial trailing block only feeds rows that are
    # never written back.  Guarantee >=2 blocks on the parallel axes so v7x's
    # second TensorCore gets work (harmless on single-TC v5e/v6e).
    tm = n_rows if n_rows <= tm_max else tm_max
    m_blocks = _cdiv(n_rows, tm)
    if m_blocks * n_blocks_total < 2 and n_rows >= 16:
        tm = ((_cdiv(n_rows, 2) + 7) // 8) * 8
        m_blocks = _cdiv(n_rows, tm)

    grid = (m_blocks, n_blocks_total, k_blocks)

    # VMEM budget: double-buffered x/w/bias + double-buffered out + f32 acc.
    x_elem = x2d.dtype.itemsize
    o_elem = jnp.dtype(out_dtype).itemsize
    est = (2 * tm * tk * x_elem + 2 * tk * tn * w_elem + 2 * tn * 4
           + 2 * tm * tn * o_elem + tm * tn * 4)
    vmem_limit = int(max(32 << 20, min(est + (16 << 20), vmem_cap - (8 << 20))))

    kernel = functools.partial(_matmul_bias_kernel, group_tiles=group_tiles)
    compiler_params = pltpu.CompilerParams(
        dimension_semantics=("parallel", "parallel", "arbitrary"),
        vmem_limit_bytes=vmem_limit,
    )

    if use_grouped:
        # Group index derived from the output-column block j.
        x_map = lambda i, j, k: (i, (j // n_g_blocks) * k_blocks + k)
        w_map = lambda i, j, k: (j // n_g_blocks, k, j % n_g_blocks)
        in_specs = [
            pl.BlockSpec((tm, tk), x_map),            # x columns of group(j)
            pl.BlockSpec((None, tk, tn), w_map),      # per-group weight tile
            pl.BlockSpec((1, tn), lambda i, j, k: (0, j)),
        ]
    else:
        in_specs = [
            pl.BlockSpec((tm, tk), lambda i, j, k: (i, k)),
            pl.BlockSpec((tk, tn), lambda i, j, k: (k, j)),
            pl.BlockSpec((1, tn), lambda i, j, k: (0, j)),
        ]

    out = pl.pallas_call(
        kernel,
        out_shape=jax.ShapeDtypeStruct((n_rows, out_channels), out_dtype),
        grid=grid,
        in_specs=in_specs,
        out_specs=pl.BlockSpec((tm, tn), lambda i, j, k: (i, j)),
        scratch_shapes=[pltpu.VMEM((tm, tn), jnp.float32)],
        compiler_params=compiler_params,
    )(x2d, w_operand, b2d)

    return out.reshape(lead + (out_channels,))


def init_params(key, in_channels, out_channels, groups, dtype=jnp.float32):
    """Deterministic init matching the module's reset_parameters.

    kaiming_uniform(weight, fan=Cin_g, a=sqrt(5)) -> U(-1/sqrt(fan), 1/sqrt(fan))
    uniform(Cin_g, bias)                          -> U(-1/sqrt(Cin_g), 1/sqrt(Cin_g))
    """
    cin_g = in_channels // groups
    cout_g = out_channels // groups
    kw, kb = jax.random.split(key)
    bound = 1.0 / math.sqrt(cin_g)
    weight = jax.random.uniform(
        kw, (groups, cin_g, cout_g), dtype=dtype, minval=-bound, maxval=bound)
    bias = jax.random.uniform(
        kb, (out_channels,), dtype=dtype, minval=-bound, maxval=bound)
    return weight, bias


def reference(src, weight, bias, groups):
    hp = jax.lax.Precision.HIGHEST
    in_channels = weight.shape[0] * weight.shape[1]
    out_channels = weight.shape[0] * weight.shape[2]
    if groups > 1:
        size = src.shape[:-1]
        x = src.reshape(-1, groups, in_channels // groups)
        x = jnp.transpose(x, (1, 0, 2))
        out = jnp.matmul(x, weight, precision=hp)
        out = jnp.transpose(out, (1, 0, 2))
        out = out.reshape(size + (out_channels,))
    else:
        out = jnp.matmul(src, weight[0], precision=hp)
    return out + bias


if __name__ == "__main__":
    key = jax.random.PRNGKey(0)
    k_x, k_p1, k_p2, k_x2, k_p3 = jax.random.split(key, 5)

    # Case 1: grouped, small per-group channels -> block-diagonal fallback.
    in_channels, out_channels, groups = 32, 32, 4
    src = jax.random.normal(k_x, (2, 8, in_channels), dtype=jnp.float32)
    weight, bias = init_params(k_p1, in_channels, out_channels, groups)
    fn = jax.jit(functools.partial(grouped_linear, groups=groups))
    out = jax.block_until_ready(fn(src, weight, bias))
    ref = reference(src, weight, bias, groups)
    assert out.shape == (2, 8, out_channels)
    assert jnp.allclose(out, ref, atol=5e-3, rtol=5e-3)

    # Case 2: groups == 1 (plain dense path, same kernel).
    weight1, bias1 = init_params(k_p2, in_channels, out_channels, 1)
    fn1 = jax.jit(functools.partial(grouped_linear, groups=1))
    out1 = jax.block_until_ready(fn1(src, weight1, bias1))
    ref1 = reference(src, weight1, bias1, 1)
    assert out1.shape == (2, 8, out_channels)
    assert jnp.allclose(out1, ref1, atol=5e-3, rtol=5e-3)

    # Case 3: grouped with 128-aligned per-group channels -> true grouped grid
    # (weight kept as (G, Cin_g, Cout_g), no block-diagonal materialization).
    in_c2, out_c2, groups2 = 256, 256, 2
    src2 = jax.random.normal(k_x2, (2, 8, in_c2), dtype=jnp.float32)
    weight2, bias2 = init_params(k_p3, in_c2, out_c2, groups2)
    fn2 = jax.jit(functools.partial(grouped_linear, groups=groups2))
    out2 = jax.block_until_ready(fn2(src2, weight2, bias2))
    ref2 = reference(src2, weight2, bias2, groups2)
    assert out2.shape == (2, 8, out_c2)
    assert jnp.allclose(out2, ref2, atol=5e-3, rtol=5e-3)

    print("KERNEL_OK")
</pallas_src>

<mosaic_0001>
module attributes {stable_mosaic.version = 11 : i64} {
  func.func @_matmul_bias_kernel(%arg0: i32, %arg1: i32, %arg2: i32, %arg3: memref<8x32xf32, #tpu.memory_space<vmem>>, %arg4: memref<32x32xf32, #tpu.memory_space<vmem>>, %arg5: memref<1x32xf32, #tpu.memory_space<vmem>>, %arg6: memref<8x32xf32, #tpu.memory_space<vmem>>, %arg7: memref<8x32xf32, #tpu.memory_space<vmem>>) attributes {dimension_semantics = [#tpu.dimension_semantics<parallel>, #tpu.dimension_semantics<parallel>, #tpu.dimension_semantics<arbitrary>], iteration_bounds = array<i64: 2, 1, 1>, scalar_prefetch = 0 : i64, scratch_operands = 1 : i64, tpu.core_type = #tpu.core_type<tc>, window_params = [{transform_indices = @transform_0, window_bounds = array<i64: 8, 32>}, {transform_indices = @transform_1, window_bounds = array<i64: 32, 32>}, {transform_indices = @transform_2, window_bounds = array<i64: 1, 32>}, {transform_indices = @transform_3, window_bounds = array<i64: 8, 32>}]} {
    %c0_i32 = arith.constant 0 : i32
    %0 = arith.cmpi eq, %arg2, %c0_i32 : i32
    %1 = arith.extui %0 : i1 to i32
    %c0_i32_0 = arith.constant 0 : i32
    %2 = arith.cmpi ne, %1, %c0_i32_0 : i32
    scf.if %2 {
      %cst = arith.constant 0.000000e+00 : f32
      %17 = vector.broadcast %cst : f32 to vector<8x32xf32>
      %c0 = arith.constant 0 : index
      %c0_8 = arith.constant 0 : index
      %18 = vector.load %arg7[%c0, %c0_8] : memref<8x32xf32, #tpu.memory_space<vmem>>, vector<8x32xf32>
      tpu.vector_store %arg7[%c0, %c0_8], %17 {strides = array<i32>} : memref<8x32xf32, #tpu.memory_space<vmem>>, vector<8x32xf32>,
    } else {
    }
    %c4_i32 = arith.constant 4 : i32
    %3 = arith.muli %arg2, %c4_i32 : i32
    %c1_i32 = arith.constant 1 : i32
    %4 = arith.addi %arg1, %c1_i32 : i32
    %c4_i32_1 = arith.constant 4 : i32
    %5 = arith.muli %4, %c4_i32_1 : i32
    %6 = arith.cmpi slt, %3, %5 : i32
    %c4_i32_2 = arith.constant 4 : i32
    %7 = arith.muli %arg1, %c4_i32_2 : i32
    %c1_i32_3 = arith.constant 1 : i32
    %8 = arith.addi %arg2, %c1_i32_3 : i32
    %c4_i32_4 = arith.constant 4 : i32
    %9 = arith.muli %8, %c4_i32_4 : i32
    %10 = arith.cmpi slt, %7, %9 : i32
    %11 = arith.andi %6, %10 : i1
    %12 = arith.extui %11 : i1 to i32
    %c0_i32_5 = arith.constant 0 : i32
    %13 = arith.cmpi ne, %12, %c0_i32_5 : i32
    scf.if %13 {
      %c0 = arith.constant 0 : index
      %c0_8 = arith.constant 0 : index
      %17 = vector.load %arg7[%c0, %c0_8] : memref<8x32xf32, #tpu.memory_space<vmem>>, vector<8x32xf32>
      %c0_9 = arith.constant 0 : index
      %c0_10 = arith.constant 0 : index
      %18 = vector.load %arg3[%c0_9, %c0_10] : memref<8x32xf32, #tpu.memory_space<vmem>>, vector<8x32xf32>
      %c0_11 = arith.constant 0 : index
      %c0_12 = arith.constant 0 : index
      %19 = vector.load %arg4[%c0_11, %c0_12] : memref<32x32xf32, #tpu.memory_space<vmem>>, vector<32x32xf32>
      %cst = arith.constant dense<0.000000e+00> : vector<8x32xf32>
      %20 = tpu.matmul %18, %19, %cst {dimension_numbers = #tpu.dot_dimension_numbers<[1], [0], [0], [1], [0, 0, 1, 1], [], []>} : vector<8x32xf32>, vector<32x32xf32>, vector<8x32xf32> -> vector<8x32xf32>
      %21 = arith.addf %17, %20 : vector<8x32xf32>
      %c0_13 = arith.constant 0 : index
      %c0_14 = arith.constant 0 : index
      %22 = vector.load %arg7[%c0_13, %c0_14] : memref<8x32xf32, #tpu.memory_space<vmem>>, vector<8x32xf32>
      tpu.vector_store %arg7[%c0_13, %c0_14], %21 {strides = array<i32>} : memref<8x32xf32, #tpu.memory_space<vmem>>, vector<8x32xf32>,
    } else {
    }
    %c0_i32_6 = arith.constant 0 : i32
    %14 = arith.cmpi eq, %arg2, %c0_i32_6 : i32
    %15 = arith.extui %14 : i1 to i32
    %c0_i32_7 = arith.constant 0 : i32
    %16 = arith.cmpi ne, %15, %c0_i32_7 : i32
    scf.if %16 {
      %c0 = arith.constant 0 : index
      %c0_8 = arith.constant 0 : index
      %17 = vector.load %arg7[%c0, %c0_8] : memref<8x32xf32, #tpu.memory_space<vmem>>, vector<8x32xf32>
      %c0_9 = arith.constant 0 : index
      %c0_10 = arith.constant 0 : index
      %18 = vector.load %arg5[%c0_9, %c0_10] : memref<1x32xf32, #tpu.memory_space<vmem>>, vector<1x32xf32>
      %19 = vector.broadcast %18 : vector<1x32xf32> to vector<8x32xf32>
      %20 = arith.addf %17, %19 : vector<8x32xf32>
      %c0_11 = arith.constant 0 : index
      %c0_12 = arith.constant 0 : index
      %21 = vector.load %arg6[%c0_11, %c0_12] : memref<8x32xf32, #tpu.memory_space<vmem>>, vector<8x32xf32>
      tpu.vector_store %arg6[%c0_11, %c0_12], %20 {strides = array<i32>} : memref<8x32xf32, #tpu.memory_space<vmem>>, vector<8x32xf32>,
    } else {
    }
    return
  }
  func.func @transform_0(%arg0: i32, %arg1: i32, %arg2: i32) -> (i32, i32) {
    %c0_i32 = arith.constant 0 : i32
    return %arg0, %arg2 : i32, i32
  }
  func.func @transform_1(%arg0: i32, %arg1: i32, %arg2: i32) -> (i32, i32) {
    %c0_i32 = arith.constant 0 : i32
    return %arg2, %arg1 : i32, i32
  }
  func.func @transform_2(%arg0: i32, %arg1: i32, %arg2: i32) -> (i32, i32) {
    %c0_i32 = arith.constant 0 : i32
    %c0_i32_0 = arith.constant 0 : i32
    return %c0_i32, %arg1 : i32, i32
  }
  func.func @transform_3(%arg0: i32, %arg1: i32, %arg2: i32) -> (i32, i32) {
    %c0_i32 = arith.constant 0 : i32
    return %arg0, %arg1 : i32, i32
  }
}

</mosaic_0001>

<bundles_post_ra>
// kernel: grouped_linear.1
= control target key start
LH: loop header
LB: loop body
LE: loop exit
PB: predicated region body
PF: predicated region fallthrough
CT: control target
= control target key end

     0   :  { %8 = vsyncpa [#allocation4], 0  ;;  %s808_s0 = inlined_call_operand.vmem [shape: f32[16,32], index: 0, kind: input, shape index: {}]   ;;  %s809_s1 = inlined_call_operand.vmem [shape: f32[32,32], index: 1, kind: input, shape index: {}]   ;;  %s810_s2 = inlined_call_operand.vmem [shape: f32[1,32], index: 2, kind: input, shape index: {}]   ;;  %s811_s3 = inlined_call_operand.hbm [shape: f32[16,32], index: 3, kind: output, shape index: {}]  }
   0x1   :  { %10 = vsyncpa [#allocation4 + $0x1], 0  ;;  %s677_s12 = smov 0   ;;  %s679_s13 = smov 0  }
   0x2   :  { %s681_s14 = smov 0   ;;  %s683_s15 = smov 0  }
   0x3   :  { %s685_s16 = smov 0   ;;  %s687_s17 = smov 0  }
   0x4 LB: > { %s478_s18 = sadd.s32 4294967295, %s651_s17   ;;  %s479_s19 = sadd.s32 4294967294, %s651_s17   ;;  %s651_s17 = sphi %s687_s17, %s16_s17   ;;  %s647_s16 = sphi %s685_s16, %s818_s16   ;;  %s643_s15 = sphi %s683_s15, %s817_s15   ;;  %s639_s14 = sphi %s681_s14, %s816_s14   ;;  %s635_s13 = sphi %s679_s13, %s815_s13   ;;  %s631_s12 = sphi %s677_s12, %s814_s12  }
   0x5   : > { %s35_s20 = sadd.s32 1, %s647_s16  ;;  %s126_s21 = sadd.s32 1, %s639_s14 }
   0x6   : > { %p37_p0 = scmp.ge.s32.totalorder %s35_s20, 2  ;;  %p136_p1 = scmp.ne.s32.totalorder %s639_s14, %s635_s13 }
   0x7   : > { %p137_p2 = scmp.eq.s32.totalorder %s478_s18, 1  ;;  %p142_p3 = scmp.ne.s32.totalorder %s635_s13, %s631_s12 }
   0x8   : > { %s820_s20 = smov (%p37_p0, %s35_s20), 0  ;;  %p143_p5 = scmp.eq.s32.totalorder %s479_s19, 1 }
   0x9   : > { %p717_p4 = por %p137_p2, %p136_p1  ;;  %s121_s23 = ssub.s32 %s647_s16, %s820_s20 }
   0xa   : > { %p484_p6 = scmp.ge.s32.totalorder %s651_s17, 1  ;;  %p124_p7 = scmp.eq.s32.totalorder %s121_s23, 0 }
   0xb   : > { %p724_p8 = por %p143_p5, %p142_p3  ;;  %p189_p9 = scmp.lt.s32.totalorder %s651_s17, 3 }
   0xc   : > { %s730_s25 = scalar_select %p124_p7, %s639_s14, %s126_s21  }
   0xd   : > { %p190_p10 = pnand %p484_p6, %p189_p9 }
   0xe   : > { %v265_v0 = vld [vmem:[%s809_s1] sm:$0xff] (!%p190_p10)  ;;  %v266_v1 = vld [vmem:[%s809_s1 + $0x8] sm:$0xff] (!%p190_p10)  ;;  %v267_v2 = vld [vmem:[%s809_s1 + $0x10] sm:$0xff] (!%p190_p10)  ;;  %vm249_vm0 = vcmask (!%p190_p10), 261120   ;;  %v653_v3 = vmov (!%p190_p10), 0.0|0.0   ;;  %v654_v6 = vmov (!%p190_p10), 0.0  }
   0xf   : > { %193 = sbr.rel (%p190_p10) target bundleno = 265 (0x109), region = 32  ;;  %509 = vmatprep.subr.bf16.mxu0 (!%p190_p10), %v653_v3  ;;  %v510_v4 = vpack.c.bf16 (!%p190_p10), %v266_v1, %v265_v0  ;;  %v268_v5 = vld [vmem:[%s809_s1 + $0x18] sm:$0xff] (!%p190_p10)  ;;  %250 = vst.msk [vmem:[#allocation2] sm:$0xff] (!%p190_p10), %vm249_vm0, %v654_v6  ;;  %p226_p11 = scmp.lt.s32.totalorder (!%p190_p10), %s643_s15, 1  ;;  %vm655_vm1 = vmmov (!%p190_p10), 0  }
  0x10   : > { %506 = vmatprep.mubr.msk.f32.mxu0 (!%p190_p10), %vm655_vm1, %v654_v6  ;;  %v513_v7 = vpack.c.bf16 (!%p190_p10), %v268_v5, %v267_v2  ;;  %s223_s18 = sand.u32 (!%p190_p10), 1, %s635_s13   ;;  %v488_v13 = vld [vmem:[%s810_s2] ss:$0 sm:$0xff] (!%p190_p10)  ;;  %s490_s26 = sshll.u32 (!%p190_p10), %s643_s15, 7 }
  0x11   : > { %511 = vmatpush3.bf16.msra.mxu0 (!%p190_p10), %v510_v4  ;;  %s485_s19 = sshll.u32 (!%p190_p10), %s223_s18, 3  ;;  %s760_s4 = scalar_lea.hbm (!%p190_p10), %s811_s3, %s490_s26 }
  0x12   : > { %512 = vmatprep.subr.bf16.mxu0 (!%p190_p10), %v653_v3  ;;  %s225_s27 = scalar_lea.vmem (!%p190_p10), [#allocation3], %s485_s19  ;;  %s360_s5 = scalar_lea.sflag (!%p190_p10), [#allocation4], %s223_s18 }
  0x13   : > { %s374_s28 = sshll.u32 (!%p190_p10), %s225_s27, 4  ;;  %s762_s28 = int_to_ptr.vmem [resolvable:$true] %s374_s28 }
  0x14   : > { %s573_s6 = scalar_lea.vmem (!%p190_p10), %s762_s28, 128 }
  0x15   : > { %514 = vmatpush3.bf16.msra.mxu0 (!%p190_p10), %v513_v7  ;;  %p574_p12 = scmp.ne.s32.totalorder (!%p190_p10), %s762_s28, %s573_s6 }
  0x16   : > { %s227_s7 = scalar_select %p226_p11, %s643_s15, 1  ;;  %v263_v9 = vld [vmem:[#allocation2] sm:$0xff] }
  0x17   : > { %p575_p13 = pnand %p574_p12, %p717_p4  ;;  %s656_s15 = smov [#allocation3]  }
  0x18   : > { %s486_s8 = sshll.u32 %s227_s7, 3  ;;  %s577_s7 = sshll.u32 %s656_s15, 4  ;;  %s578_s7 = int_to_ptr.vmem [resolvable:$false] %s577_s7 }
  0x19   : > { %s232_s11 = scalar_lea.vmem %s808_s0, %s486_s8  ;;  %p576_p0 = pneg %p575_p13 }
  0x1a   : > { %v264_v8 = vld [vmem:[%s232_s11] sm:$0xff]  ;;  %s579_s8 = scalar_lea.vmem %s578_s7, 256  ;;  %p580_p1 = scmp.lt.s32.totalorder %s762_s28, %s578_s7 }
  0x1b   : > { %507 = vmatmul.mubr.msk.f32.vlgmr.msra.gmra.mrb[0].mxu0 %vm249_vm0, %v264_v8  ;;  %p581_p2 = scmp.lt.s32.totalorder %s579_s8, %s573_s6 }
  0x1d   : > { %p582_p3 = por %p581_p2, %p580_p1 }
  0x1f   : > { %p583_p5 = pnand %p582_p3, %p576_p0 }
  0xee   : > { %v339_v10 = vpop.f32.mrb[0].mxu0 }
  0xef   : > { %v343_v11 = vadd.f32 %v339_v10, %v263_v9  ;;  %v508_v12 = vpop.f32.mrb[1].mxu0 }
  0xf1   : > { %344 = vst.msk [vmem:[#allocation2] sm:$0xff] %vm249_vm0, %v343_v11 }
  0xf8   : > { %v348_v14 = vld [vmem:[#allocation2] sm:$0xff] }
  0xf9   : > { %v356_v15 = vadd.f32 %v488_v13, %v348_v14 }
  0xfb   : > { %358 = vst.msk [vmem:[%s225_s27] sm:$0xff] %vm249_vm0, %v356_v15 }
  0xfc   : > { %586 = shalt.err (!%p583_p5)
}
  0xfd   : > { %s587_s9 = scalar_lea.hbm %s760_s4, 128  ;;  %s591_s18 = scalar_lea.hbm %s811_s3, 256 }
  0xfe   : > { %p588_p6 = scmp.ne.s32.totalorder %s760_s4, %s587_s9  ;;  %p592_p10 = scmp.lt.u32.totalorder %s760_s4, %s811_s3 }
  0xff   : > { %p593_p11 = scmp.lt.u32.totalorder %s591_s18, %s587_s9  ;;  %p595_p13 = scmp.lt.u32.totalorder %s587_s9, %s760_s4 }
 0x100   : > { %p589_p7 = pnand %p588_p6, %p717_p4 }
 0x101   : > { %p594_p12 = por %p593_p11, %p592_p10 }
 0x102   : > { %p590_p9 = pneg %p589_p7 }
 0x103   : > { %p596_p0 = por %p595_p13, %p594_p12 }
 0x105   : > { %p597_p1 = pnand %p596_p0, %p590_p9 }
 0x107   : > { %600 = shalt.err (!%p597_p1)
}
 0x108   : > { %515 = dma.vmem_to_hbm [thread:$0]  (%p717_p4), %s762_s28, 128, %s760_s4, %s360_s5  }
 0x109 PF: > { %p521_p2 = scmp.ge.s32.totalorder %s651_s17, 2  ;;  %s386_s23 = sand.u32 1, %s631_s12  }
 0x10a   : > { %s387_s26 = scalar_lea.sflag [#allocation4], %s386_s23 }
 0x10b   : > { %p518_p3 = pnand %p521_p2, %p724_p8 }
 0x10d   : > { %626 = dma.done.wait (!%p518_p3), %s387_s26, 128  }
 0x10e   : > { %628 = vsyncadd (!%p518_p3), %s387_s26, 4294967168  ;;  %s16_s17 = sadd.s32 1, %s651_s17   ;;  %s814_s12 = smov %s635_s13 }
 0x10f   : > { %p13_p5 = scmp.ge.s32.totalorder %s16_s17, 4   ;;  %s815_s13 = smov %s639_s14 }
 0x110   : > { %s816_s14 = smov %s730_s25  ;;  %s817_s15 = smov %s647_s16 }
 0x111   : > { %s818_s16 = smov %s820_s20  ;;  %15 = sbr.rel (!%p13_p5) target bundleno = 4 (0x4), region = 85 }
 0x118   :  { %392 = vsyncpa [#allocation4], 1 }
 0x119   :  { %394 = vsyncpa [#allocation4 + $0x1], 1 }

</bundles_post_ra>
